<compile_context>
chip_gen: v7x
topology: tpu7x:2x2x1
jax: 0.10.0
libtpu: 0.0.40
codegen_flags: <defaults>
</compile_context>

<pallas_src>
import functools

import jax
import jax.numpy as jnp
from jax.experimental import pallas as pl
from jax.experimental.pallas import tpu as pltpu

IN_DIM = 784
H1_DIM = 512
H2_DIM = 256
OUT_PAD = 128  # layer-3 output padded 1 -> 128 lanes for a lane-dense store


def _round_up(n, m):
    return ((n + m - 1) // m) * m


def _leaky_relu(x, slope=0.2):
    return jnp.where(x > 0, x, slope * x)


def discriminator_kernel(x_ref, w1_ref, b1_ref, w2_ref, b2_ref, w3_ref, b3_ref,
                         o_ref):
    # layer1: Linear(784, 512) + LeakyReLU(0.2)   (bf16 x bf16 -> f32 acc)
    h1 = jnp.dot(x_ref[...], w1_ref[...],
                 preferred_element_type=jnp.float32) + b1_ref[...]
    h1 = _leaky_relu(h1)

    # layer2: Linear(512, 256) + LeakyReLU(0.2)
    h2 = jnp.dot(h1.astype(jnp.bfloat16), w2_ref[...],
                 preferred_element_type=jnp.float32) + b2_ref[...]
    h2 = _leaky_relu(h2)

    # layer3: Linear(256, 1) + Sigmoid, computed on 128 padded output lanes so
    # both the matmul RHS and the store are lane-dense (wrapper slices col 0).
    h3 = jnp.dot(h2.astype(jnp.bfloat16), w3_ref[...],
                 preferred_element_type=jnp.float32) + b3_ref[...]
    o_ref[...] = jax.nn.sigmoid(h3)


@functools.partial(jax.jit, static_argnames=("tb",))
def discriminator_forward(x, params, *, tb=256):
    """x: (B, 784) float32 -> (B, 1) float32 in [0, 1]."""
    w1, b1, w2, b2, w3, b3 = params  # w*: bf16 (in,out); b*: (1,N) f32; w3/b3 lane-padded
    B = x.shape[0]

    # Batch tile: multiple of 8 sublanes, capped at 256 (one MXU M-pass on v6e/v7x).
    tb = max(8, min(_round_up(tb, 8), 256, _round_up(B, 8)))
    b_pad = _round_up(B, tb)

    xb = x.astype(jnp.bfloat16)
    if b_pad != B:
        xb = jnp.pad(xb, ((0, b_pad - B), (0, 0)))

    grid = (b_pad // tb,)

    flops = 2 * b_pad * (IN_DIM * H1_DIM + H1_DIM * H2_DIM + H2_DIM * OUT_PAD)
    bytes_accessed = int(
        xb.size * xb.dtype.itemsize
        + sum(int(p.size) * p.dtype.itemsize for p in params)
        + b_pad * OUT_PAD * 4)

    out = pl.pallas_call(
        discriminator_kernel,
        out_shape=jax.ShapeDtypeStruct((b_pad, OUT_PAD), jnp.float32),
        grid_spec=pltpu.PrefetchScalarGridSpec(
            num_scalar_prefetch=0,
            grid=grid,
            in_specs=[
                # x tiles stream along the batch grid axis.
                pl.BlockSpec((tb, IN_DIM), lambda i: (i, 0)),
                # Weights / biases: constant index_map -> fetched once, VMEM-resident.
                pl.BlockSpec((IN_DIM, H1_DIM), lambda i: (0, 0)),
                pl.BlockSpec((1, H1_DIM), lambda i: (0, 0)),
                pl.BlockSpec((H1_DIM, H2_DIM), lambda i: (0, 0)),
                pl.BlockSpec((1, H2_DIM), lambda i: (0, 0)),
                pl.BlockSpec((H2_DIM, OUT_PAD), lambda i: (0, 0)),
                pl.BlockSpec((1, OUT_PAD), lambda i: (0, 0)),
            ],
            out_specs=pl.BlockSpec((tb, OUT_PAD), lambda i: (i, 0)),
        ),
        compiler_params=pltpu.CompilerParams(
            dimension_semantics=("parallel",)),
        cost_estimate=pl.CostEstimate(
            flops=flops,
            transcendentals=b_pad * OUT_PAD,
            bytes_accessed=bytes_accessed),
    )(xb, w1, b1, w2, b2, w3, b3)

    # Drop batch padding and the 127 padded output lanes.
    return out[:B, :1]


def init_params(key):
    """Deterministic synthetic parameters matching the module's layer shapes.

    Weights are stored transposed vs nn.Linear, i.e. (in, out), so y = x @ W + b.
    Weights are bf16 (native MXU dtype, half the HBM traffic); biases stay f32.
    Layer-3 weight/bias are zero-padded from 1 -> 128 output lanes.
    """
    dims = [(IN_DIM, H1_DIM), (H1_DIM, H2_DIM), (H2_DIM, 1)]
    params = []
    for i, (fan_in, fan_out) in enumerate(dims):
        kw, kb = jax.random.split(jax.random.fold_in(key, i))
        bound = 1.0 / jnp.sqrt(fan_in)  # matches nn.Linear default init range
        w = jax.random.uniform(kw, (fan_in, fan_out), jnp.float32, -bound, bound)
        b = jax.random.uniform(kb, (1, fan_out), jnp.float32, -bound, bound)
        if fan_out == 1:  # pad layer 3 to a lane-dense 128-wide tile
            w = jnp.pad(w, ((0, 0), (0, OUT_PAD - 1)))
            b = jnp.pad(b, ((0, 0), (0, OUT_PAD - 1)))
        params += [w.astype(jnp.bfloat16), b.astype(jnp.float32)]
    return tuple(params)


def reference_forward(x, params):
    """Pure-JAX reference with the same bf16-input / f32-accumulate semantics."""
    w1, b1, w2, b2, w3, b3 = params
    xb = x.astype(jnp.bfloat16)
    h1 = jnp.dot(xb, w1, preferred_element_type=jnp.float32) + b1
    h1 = jnp.where(h1 > 0, h1, 0.2 * h1)
    h2 = jnp.dot(h1.astype(jnp.bfloat16), w2, preferred_element_type=jnp.float32) + b2
    h2 = jnp.where(h2 > 0, h2, 0.2 * h2)
    h3 = jnp.dot(h2.astype(jnp.bfloat16), w3, preferred_element_type=jnp.float32) + b3
    return jax.nn.sigmoid(h3)[:, :1]


if __name__ == "__main__":
    key = jax.random.PRNGKey(0)
    k_x, k_p = jax.random.split(key)

    B = 16
    x = jax.random.normal(k_x, (B, IN_DIM), dtype=jnp.float32)
    params = init_params(k_p)

    # Small tile so the batch grid (and its pipelining) is actually exercised.
    out = discriminator_forward(x, params, tb=8)
    out = jax.block_until_ready(out)

    ref = reference_forward(x, params)
    assert out.shape == (B, 1), out.shape
    assert bool(jnp.all((out >= 0.0) & (out <= 1.0))), "sigmoid output out of range"
    assert jnp.allclose(out, ref, atol=2e-3, rtol=2e-3), "mismatch vs JAX reference"

    print("KERNEL_OK")
</pallas_src>

<mosaic_0001>
module attributes {stable_mosaic.version = 11 : i64} {
  func.func @discriminator_kernel(%arg0: i32, %arg1: memref<8x784xbf16, #tpu.memory_space<vmem>>, %arg2: memref<784x512xbf16, #tpu.memory_space<vmem>>, %arg3: memref<1x512xf32, #tpu.memory_space<vmem>>, %arg4: memref<512x256xbf16, #tpu.memory_space<vmem>>, %arg5: memref<1x256xf32, #tpu.memory_space<vmem>>, %arg6: memref<256x128xbf16, #tpu.memory_space<vmem>>, %arg7: memref<1x128xf32, #tpu.memory_space<vmem>>, %arg8: memref<8x128xf32, #tpu.memory_space<vmem>>) attributes {dimension_semantics = [#tpu.dimension_semantics<parallel>], iteration_bounds = array<i64: 2>, scalar_prefetch = 0 : i64, scratch_operands = 0 : i64, tpu.core_type = #tpu.core_type<tc>, window_params = [{transform_indices = @transform_0, window_bounds = array<i64: 8, 784>}, {pipeline_mode = #tpu.pipeline_mode<synchronous>, transform_indices = @transform_1, window_bounds = array<i64: 784, 512>}, {pipeline_mode = #tpu.pipeline_mode<synchronous>, transform_indices = @transform_2, window_bounds = array<i64: 1, 512>}, {pipeline_mode = #tpu.pipeline_mode<synchronous>, transform_indices = @transform_3, window_bounds = array<i64: 512, 256>}, {pipeline_mode = #tpu.pipeline_mode<synchronous>, transform_indices = @transform_4, window_bounds = array<i64: 1, 256>}, {pipeline_mode = #tpu.pipeline_mode<synchronous>, transform_indices = @transform_5, window_bounds = array<i64: 256, 128>}, {pipeline_mode = #tpu.pipeline_mode<synchronous>, transform_indices = @transform_6, window_bounds = array<i64: 1, 128>}, {transform_indices = @transform_7, window_bounds = array<i64: 8, 128>}]} {
    %c0 = arith.constant 0 : index
    %c0_0 = arith.constant 0 : index
    %0 = vector.load %arg1[%c0, %c0_0] : memref<8x784xbf16, #tpu.memory_space<vmem>>, vector<8x784xbf16>
    %c0_1 = arith.constant 0 : index
    %c0_2 = arith.constant 0 : index
    %1 = vector.load %arg2[%c0_1, %c0_2] : memref<784x512xbf16, #tpu.memory_space<vmem>>, vector<784x512xbf16>
    %cst = arith.constant dense<0.000000e+00> : vector<8x512xf32>
    %2 = tpu.matmul %0, %1, %cst {dimension_numbers = #tpu.dot_dimension_numbers<[1], [0], [0], [1], [0, 0, 1, 1], [], []>} : vector<8x784xbf16>, vector<784x512xbf16>, vector<8x512xf32> -> vector<8x512xf32>
    %c0_3 = arith.constant 0 : index
    %c0_4 = arith.constant 0 : index
    %3 = vector.load %arg3[%c0_3, %c0_4] : memref<1x512xf32, #tpu.memory_space<vmem>>, vector<1x512xf32>
    %4 = vector.broadcast %3 : vector<1x512xf32> to vector<8x512xf32>
    %5 = arith.addf %2, %4 : vector<8x512xf32>
    %cst_5 = arith.constant 0.000000e+00 : f32
    %6 = vector.broadcast %cst_5 : f32 to vector<8x512xf32>
    %7 = arith.cmpf ogt, %5, %6 : vector<8x512xf32>
    %cst_6 = arith.constant 2.000000e-01 : f32
    %8 = vector.broadcast %cst_6 : f32 to vector<8x512xf32>
    %9 = arith.mulf %8, %5 : vector<8x512xf32>
    %10 = arith.select %7, %5, %9 : vector<8x512xi1>, vector<8x512xf32>
    %11 = arith.truncf %10 : vector<8x512xf32> to vector<8x512xbf16>
    %c0_7 = arith.constant 0 : index
    %c0_8 = arith.constant 0 : index
    %12 = vector.load %arg4[%c0_7, %c0_8] : memref<512x256xbf16, #tpu.memory_space<vmem>>, vector<512x256xbf16>
    %cst_9 = arith.constant dense<0.000000e+00> : vector<8x256xf32>
    %13 = tpu.matmul %11, %12, %cst_9 {dimension_numbers = #tpu.dot_dimension_numbers<[1], [0], [0], [1], [0, 0, 1, 1], [], []>} : vector<8x512xbf16>, vector<512x256xbf16>, vector<8x256xf32> -> vector<8x256xf32>
    %c0_10 = arith.constant 0 : index
    %c0_11 = arith.constant 0 : index
    %14 = vector.load %arg5[%c0_10, %c0_11] : memref<1x256xf32, #tpu.memory_space<vmem>>, vector<1x256xf32>
    %15 = vector.broadcast %14 : vector<1x256xf32> to vector<8x256xf32>
    %16 = arith.addf %13, %15 : vector<8x256xf32>
    %cst_12 = arith.constant 0.000000e+00 : f32
    %17 = vector.broadcast %cst_12 : f32 to vector<8x256xf32>
    %18 = arith.cmpf ogt, %16, %17 : vector<8x256xf32>
    %cst_13 = arith.constant 2.000000e-01 : f32
    %19 = vector.broadcast %cst_13 : f32 to vector<8x256xf32>
    %20 = arith.mulf %19, %16 : vector<8x256xf32>
    %21 = arith.select %18, %16, %20 : vector<8x256xi1>, vector<8x256xf32>
    %22 = arith.truncf %21 : vector<8x256xf32> to vector<8x256xbf16>
    %c0_14 = arith.constant 0 : index
    %c0_15 = arith.constant 0 : index
    %23 = vector.load %arg6[%c0_14, %c0_15] : memref<256x128xbf16, #tpu.memory_space<vmem>>, vector<256x128xbf16>
    %cst_16 = arith.constant dense<0.000000e+00> : vector<8x128xf32>
    %24 = tpu.matmul %22, %23, %cst_16 {dimension_numbers = #tpu.dot_dimension_numbers<[1], [0], [0], [1], [0, 0, 1, 1], [], []>} : vector<8x256xbf16>, vector<256x128xbf16>, vector<8x128xf32> -> vector<8x128xf32>
    %c0_17 = arith.constant 0 : index
    %c0_18 = arith.constant 0 : index
    %25 = vector.load %arg7[%c0_17, %c0_18] : memref<1x128xf32, #tpu.memory_space<vmem>>, vector<1x128xf32>
    %26 = vector.broadcast %25 : vector<1x128xf32> to vector<8x128xf32>
    %27 = arith.addf %24, %26 : vector<8x128xf32>
    %28 = arith.negf %27 : vector<8x128xf32>
    %29 = math.exp %28 : vector<8x128xf32>
    %cst_19 = arith.constant 1.000000e+00 : f32
    %30 = vector.broadcast %cst_19 : f32 to vector<8x128xf32>
    %31 = arith.addf %30, %29 : vector<8x128xf32>
    %32 = arith.divf %30, %31 : vector<8x128xf32>
    %c0_20 = arith.constant 0 : index
    %c0_21 = arith.constant 0 : index
    %33 = vector.load %arg8[%c0_20, %c0_21] : memref<8x128xf32, #tpu.memory_space<vmem>>, vector<8x128xf32>
    tpu.vector_store %arg8[%c0_20, %c0_21], %32 {strides = array<i32>} : memref<8x128xf32, #tpu.memory_space<vmem>>, vector<8x128xf32>,
    return
  }
  func.func @transform_0(%arg0: i32) -> (i32, i32) {
    %c0_i32 = arith.constant 0 : i32
    %c0_i32_0 = arith.constant 0 : i32
    return %arg0, %c0_i32 : i32, i32
  }
  func.func @transform_1(%arg0: i32) -> (i32, i32) {
    %c0_i32 = arith.constant 0 : i32
    %c0_i32_0 = arith.constant 0 : i32
    %c0_i32_1 = arith.constant 0 : i32
    return %c0_i32, %c0_i32_0 : i32, i32
  }
  func.func @transform_2(%arg0: i32) -> (i32, i32) {
    %c0_i32 = arith.constant 0 : i32
    %c0_i32_0 = arith.constant 0 : i32
    %c0_i32_1 = arith.constant 0 : i32
    return %c0_i32, %c0_i32_0 : i32, i32
  }
  func.func @transform_3(%arg0: i32) -> (i32, i32) {
    %c0_i32 = arith.constant 0 : i32
    %c0_i32_0 = arith.constant 0 : i32
    %c0_i32_1 = arith.constant 0 : i32
    return %c0_i32, %c0_i32_0 : i32, i32
  }
  func.func @transform_4(%arg0: i32) -> (i32, i32) {
    %c0_i32 = arith.constant 0 : i32
    %c0_i32_0 = arith.constant 0 : i32
    %c0_i32_1 = arith.constant 0 : i32
    return %c0_i32, %c0_i32_0 : i32, i32
  }
  func.func @transform_5(%arg0: i32) -> (i32, i32) {
    %c0_i32 = arith.constant 0 : i32
    %c0_i32_0 = arith.constant 0 : i32
    %c0_i32_1 = arith.constant 0 : i32
    return %c0_i32, %c0_i32_0 : i32, i32
  }
  func.func @transform_6(%arg0: i32) -> (i32, i32) {
    %c0_i32 = arith.constant 0 : i32
    %c0_i32_0 = arith.constant 0 : i32
    %c0_i32_1 = arith.constant 0 : i32
    return %c0_i32, %c0_i32_0 : i32, i32
  }
  func.func @transform_7(%arg0: i32) -> (i32, i32) {
    %c0_i32 = arith.constant 0 : i32
    %c0_i32_0 = arith.constant 0 : i32
    return %arg0, %c0_i32 : i32, i32
  }
}

</mosaic_0001>

<bundles_post_ra>
// kernel: discriminator_forward.1
= control target key start
LH: loop header
LB: loop body
LE: loop exit
PB: predicated region body
PF: predicated region fallthrough
CT: control target
= control target key end

     0   :  { %12 = vsyncpa [#allocation3], 0  ;;  %s3760_s0 = inlined_call_operand.vmem [shape: bf16[16,784], index: 0, kind: input, shape index: {}]   ;;  %s3761_s1 = inlined_call_operand.hbm [shape: bf16[784,512], index: 1, kind: input, shape index: {}]   ;;  %s3762_s2 = inlined_call_operand.vmem [shape: f32[1,512], index: 2, kind: input, shape index: {}]   ;;  %s3763_s3 = inlined_call_operand.hbm [shape: bf16[512,256], index: 3, kind: input, shape index: {}]   ;;  %s3764_s4 = inlined_call_operand.vmem [shape: f32[1,256], index: 4, kind: input, shape index: {}]   ;;  %s3765_s5 = inlined_call_operand.vmem [shape: bf16[256,128], index: 5, kind: input, shape index: {}]   ;;  %s3766_s6 = inlined_call_operand.vmem [shape: f32[1,128], index: 6, kind: input, shape index: {}]   ;;  %s3767_s7 = inlined_call_operand.vmem [shape: f32[16,128], index: 7, kind: output, shape index: {}]  }
   0x1   :  { %13 = vsyncpa [#allocation5], 0  ;;  %s3548_s24 = smov 0  }
   0x2 LB: > { %s3501_s25 = smov [#allocation2]   ;;  %s3554_s27 = sadd.s32 4294967295, %s3499_s24   ;;  %s3499_s24 = sphi %s3548_s24, %s19_s24  }
   0x3   : > { %s214_s26 = sshll.u32 %s3501_s25, 4  ;;  %p2627_p0 = scmp.ge.s32.totalorder %s3499_s24, 1  ;;  %s215_s26 = int_to_ptr.vmem [resolvable:$true] %s214_s26 }
   0x4   : > { %p202_p1 = scmp.lt.s32.totalorder %s3499_s24, 3  ;;  %p3768_p3 = scmp.eq.s32.totalorder %s3554_s27, 0 }
   0x5   : > { %s3502_s29 = smov [#allocation4]   ;;  %s3429_s11 = scalar_lea.hbm %s3761_s1, 25088 }
   0x6   : > { %p3558_p2 = pnand %p2627_p0, %p202_p1  ;;  %s230_s30 = sshll.u32 %s3502_s29, 4  ;;  %s3571_s30 = int_to_ptr.vmem [resolvable:$true] %s230_s30 }
   0x7   : > { %p3430_p6 = scmp.ne.s32.totalorder %s3761_s1, %s3429_s11  ;;  %p3436_p10 = scmp.lt.u32.totalorder %s3429_s11, %s3761_s1 }
   0x8   : > { %s3770_s28 = scalar_select %p3558_p2, 1, 0 }
   0x9   : > { %p2986_p4 = pneg %p3558_p2 }
   0xb   : > { %p3567_p5 = pnand %p3768_p3, %p2986_p4 }
   0xd   : > { %p3431_p7 = pneg %p3567_p5 }
   0xf   : > { %p3432_p8 = pnand %p3431_p7, %p3430_p6 }
  0x11   : > { %p3433_p9 = pneg %p3432_p8 }
  0x13   : > { %p3438_p11 = pnand %p3436_p10, %p3433_p9 }
  0x15   : > { %3441 = shalt.err (!%p3438_p11)
}
  0x16   : > { %s3442_s16 = scalar_lea.vmem %s215_s26, 25088  ;;  %p3450_p1 = scmp.lt.s32.totalorder %s215_s26, %s215_s26 }
  0x17   : > { %p3443_p12 = scmp.ne.s32.totalorder %s215_s26, %s3442_s16  ;;  %p3451_p4 = scmp.lt.s32.totalorder %s3442_s16, %s3442_s16 }
  0x19   : > { %p3445_p13 = pnand %p3443_p12, %p3431_p7  ;;  %p3452_p3 = por %p3451_p4, %p3450_p1 }
  0x1b   : > { %p3446_p0 = pneg %p3445_p13 }
  0x1d   : > { %p3453_p2 = pnand %p3452_p3, %p3446_p0 }
  0x1f   : > { %3456 = shalt.err (!%p3453_p2)
}
  0x20   : > { %s3503_s17 = smov 256   ;;  %s3504_s18 = smov 16  }
  0x21   : > { %2989 = dma.hbm_to_vmem [thread:$0]  (!%p3567_p5), %s3761_s1, 25088, %s215_s26, [#allocation3], %s3503_s17, %s3503_s17, %s3504_s18  }
  0x22   : > { %s3457_s23 = scalar_lea.hbm %s3763_s3, 8192 }
  0x23   : > { %p3458_p6 = scmp.ne.s32.totalorder %s3763_s3, %s3457_s23  ;;  %p3464_p8 = scmp.lt.u32.totalorder %s3457_s23, %s3763_s3 }
  0x25   : > { %p3460_p2 = pnand %p3458_p6, %p3431_p7 }
  0x27   : > { %p3461_p3 = pneg %p3460_p2 }
  0x29   : > { %p3466_p9 = pnand %p3464_p8, %p3461_p3 }
  0x2b   : > { %3469 = shalt.err (!%p3466_p9)
}
  0x2c   : > { %s3470_s26 = scalar_lea.vmem %s3571_s30, 8192  ;;  %p3478_p13 = scmp.lt.s32.totalorder %s3571_s30, %s3571_s30 }
  0x2d   : > { %p3471_p10 = scmp.ne.s32.totalorder %s3571_s30, %s3470_s26  ;;  %p3479_p0 = scmp.lt.s32.totalorder %s3470_s26, %s3470_s26 }
  0x2f   : > { %p3473_p11 = pnand %p3471_p10, %p3431_p7  ;;  %p3480_p1 = por %p3479_p0, %p3478_p13 }
  0x31   : > { %p3474_p12 = pneg %p3473_p11 }
  0x33   : > { %p3481_p4 = pnand %p3480_p1, %p3474_p12 }
  0x35   : > { %3484 = shalt.err (!%p3481_p4)
}
  0x36   : > { %s3505_s11 = smov 128   ;;  %s3506_s12 = smov 8  }
  0x37   : > { %2992 = dma.hbm_to_vmem [thread:$0]  (!%p3567_p5), %s3763_s3, 8192, %s3571_s30, [#allocation5], %s3505_s11, %s3505_s11, %s3506_s12  }
  0x38   : > { %p3772_p6 = scmp.ne.s32.totalorder %s3770_s28, 0 }
  0x39   : > { %p3773_p7 = scmp.eq.s32.totalorder (!%p3772_p6), %s3554_s27, 0 }
  0x3a   : > { %263 = sbr.rel (%p3772_p6) target bundleno = 1015 (0x3f7), region = 48 }
  0x41   : > { %3490 = dma.done.wait (%p3773_p7), [#allocation3], 25088   ;;  %p3774_p2 = pmov %p3773_p7 }
  0x43   : > { %3492 = vsyncadd (%p3774_p2), [#allocation3], 4294942208  ;;  %p3775_p3 = pmov %p3774_p2 }
  0x44   : > { %p3776_p8 = pmov %p3774_p2 }
  0x45   : > { %3494 = dma.done.wait (%p3775_p3), [#allocation5], 8192  }
  0x46   : > { %3496 = vsyncadd (%p3776_p8), [#allocation5], 4294959104  ;;  %v3012_v0 = vld [vmem:[#allocation2 + $0x4] ss:$16 sps:$4 sm:$0xff]   ;;  %v3016_v2 = vld [vmem:[#allocation2] ss:$16 sps:$4 sm:$0xff]  }
  0x47   : > { %v3014_v1 = vld [vmem:[#allocation2 + $0x204] ss:$16 sps:$4 sm:$0xff]   ;;  %1538 = vmatprep.subr.bf16.mxu1 %v3012_v0  ;;  %v3017_v3 = vld [vmem:[#allocation2 + $0x200] ss:$16 sps:$4 sm:$0xff]   ;;  %p298_p5 = scmp.lt.s32.totalorder %s3554_s27, 1  ;;  %vm1534_vm0 = vcmask 130048  }
  0x48   : > { %1579 = vmatprep.subr.bf16.mxu0 %v3014_v1  ;;  %v3018_v4 = vld [vmem:[#allocation2 + $0x24] ss:$16 sps:$4 sm:$0xff]   ;;  %1539 = vmatpush1.bf16.msra.mxu1 %v3016_v2  ;;  %v3022_v6 = vld [vmem:[#allocation2 + $0x20] ss:$16 sps:$4 sm:$0xff]  }
  0x49   : > { %1580 = vmatpush1.bf16.msra.mxu0 %v3017_v3  ;;  %v3020_v5 = vld [vmem:[#allocation2 + $0x224] ss:$16 sps:$4 sm:$0xff]   ;;  %1540 = vmatprep.subr.bf16.mxu1 %v3018_v4  ;;  %v3023_v7 = vld [vmem:[#allocation2 + $0x220] ss:$16 sps:$4 sm:$0xff]   ;;  %s3778_s27 = smov (!%p298_p5, %s3554_s27), 1 }
  0x4a   : > { %1581 = vmatprep.subr.bf16.mxu0 %v3020_v5  ;;  %v3024_v8 = vld [vmem:[#allocation2 + $0x44] ss:$16 sps:$4 sm:$0xff]   ;;  %v3028_v10 = vld [vmem:[#allocation2 + $0x40] ss:$16 sps:$4 sm:$0xff]   ;;  %s2977_s28 = smul.u32 28, %s3778_s27 }
  0x4b   : > { %v3026_v9 = vld [vmem:[#allocation2 + $0x244] ss:$16 sps:$4 sm:$0xff]   ;;  %v3029_v11 = vld [vmem:[#allocation2 + $0x240] ss:$16 sps:$4 sm:$0xff]   ;;  %v3118_v5 = vld [vmem:[#allocation2 + $0xc] ss:$16 sps:$4 sm:$0xff]  }
  0x4c   : > { %1541 = vmatpush1.bf16.msra.mxu1 %v3022_v6  ;;  %v3030_v12 = vld [vmem:[#allocation2 + $0x64] ss:$16 sps:$4 sm:$0xff]   ;;  %v3034_v14 = vld [vmem:[#allocation2 + $0x60] ss:$16 sps:$4 sm:$0xff]   ;;  %s3638_s15 = scalar_lea.vmem %s3760_s0, %s2977_s28  ;;  %s2635_s28 = sshll.u32 %s3778_s27, 3 }
  0x4d   : > { %1582 = vmatpush1.bf16.msra.mxu0 %v3023_v7  ;;  %1542 = vmatprep.subr.bf16.mxu1 %v3024_v8  ;;  %v3032_v13 = vld [vmem:[#allocation2 + $0x264] ss:$16 sps:$4 sm:$0xff]   ;;  %v3035_v15 = vld [vmem:[#allocation2 + $0x260] ss:$16 sps:$4 sm:$0xff]   ;;  %v309_v50 = vld [vmem:[%s3638_s15 + $0x8] sm:$0xff] }
  0x4e   : > { %1583 = vmatprep.subr.bf16.mxu0 %v3026_v9  ;;  %v3036_v16 = vld [vmem:[#allocation2 + $0x84] ss:$16 sps:$4 sm:$0xff]   ;;  %v3040_v18 = vld [vmem:[#allocation2 + $0x80] ss:$16 sps:$4 sm:$0xff]   ;;  %v3642_v52 = vcombine.high %v309_v50, %v309_v50  ;;  %v3647_v7 = vcombine.low %v309_v50, %v309_v50  ;;  %v3116_v9 = vld [vmem:[#allocation2 + $0x8] ss:$16 sps:$4 sm:$0xff]  }
  0x4f   : > { %v3038_v17 = vld [vmem:[#allocation2 + $0x284] ss:$16 sps:$4 sm:$0xff]   ;;  %v3041_v19 = vld [vmem:[#allocation2 + $0x280] ss:$16 sps:$4 sm:$0xff]  }
  0x50   : > { %1543 = vmatpush1.bf16.msra.mxu1 %v3028_v10  ;;  %v3042_v20 = vld [vmem:[#allocation2 + $0xa4] ss:$16 sps:$4 sm:$0xff]   ;;  %v3046_v22 = vld [vmem:[#allocation2 + $0xa0] ss:$16 sps:$4 sm:$0xff]   ;;  %1611 = vmatprep.mubr.bf16.mxu0 %v3642_v52 }
  0x51   : > { %1584 = vmatpush1.bf16.msra.mxu0 %v3029_v11  ;;  %1544 = vmatprep.subr.bf16.mxu1 %v3030_v12  ;;  %v3044_v21 = vld [vmem:[#allocation2 + $0x2a4] ss:$16 sps:$4 sm:$0xff]   ;;  %v3047_v23 = vld [vmem:[#allocation2 + $0x2a0] ss:$16 sps:$4 sm:$0xff]   ;;  %v3124_v11 = vld [vmem:[#allocation2 + $0x2c] ss:$16 sps:$4 sm:$0xff]  }
  0x52   : > { %1585 = vmatprep.subr.bf16.mxu0 %v3032_v13  ;;  %v3048_v24 = vld [vmem:[#allocation2 + $0xc4] ss:$16 sps:$4 sm:$0xff]   ;;  %v3052_v26 = vld [vmem:[#allocation2 + $0xc0] ss:$16 sps:$4 sm:$0xff]   ;;  %v3122_v13 = vld [vmem:[#allocation2 + $0x28] ss:$16 sps:$4 sm:$0xff]  }
  0x53   : > { %v3050_v25 = vld [vmem:[#allocation2 + $0x2c4] ss:$16 sps:$4 sm:$0xff]   ;;  %v3053_v27 = vld [vmem:[#allocation2 + $0x2c0] ss:$16 sps:$4 sm:$0xff]  }
  0x54   : > { %1545 = vmatpush1.bf16.msra.mxu1 %v3034_v14  ;;  %v3054_v28 = vld [vmem:[#allocation2 + $0xe4] ss:$16 sps:$4 sm:$0xff]   ;;  %v3058_v30 = vld [vmem:[#allocation2 + $0xe0] ss:$16 sps:$4 sm:$0xff]  }
  0x55   : > { %1586 = vmatpush1.bf16.msra.mxu0 %v3035_v15  ;;  %1546 = vmatprep.subr.bf16.mxu1 %v3036_v16  ;;  %v3056_v29 = vld [vmem:[#allocation2 + $0x2e4] ss:$16 sps:$4 sm:$0xff]   ;;  %v3059_v31 = vld [vmem:[#allocation2 + $0x2e0] ss:$16 sps:$4 sm:$0xff]   ;;  %v3130_v15 = vld [vmem:[#allocation2 + $0x4c] ss:$16 sps:$4 sm:$0xff]  }
  0x56   : > { %1587 = vmatprep.subr.bf16.mxu0 %v3038_v17  ;;  %v3060_v32 = vld [vmem:[#allocation2 + $0x104] ss:$16 sps:$4 sm:$0xff]   ;;  %v3064_v34 = vld [vmem:[#allocation2 + $0x100] ss:$16 sps:$4 sm:$0xff]   ;;  %v3128_v17 = vld [vmem:[#allocation2 + $0x48] ss:$16 sps:$4 sm:$0xff]  }
  0x57   : > { %v3062_v33 = vld [vmem:[#allocation2 + $0x304] ss:$16 sps:$4 sm:$0xff]   ;;  %v3065_v35 = vld [vmem:[#allocation2 + $0x300] ss:$16 sps:$4 sm:$0xff]  }
  0x58   : > { %1547 = vmatpush1.bf16.msra.mxu1 %v3040_v18  ;;  %v3066_v36 = vld [vmem:[#allocation2 + $0x124] ss:$16 sps:$4 sm:$0xff]   ;;  %v3070_v38 = vld [vmem:[#allocation2 + $0x120] ss:$16 sps:$4 sm:$0xff]  }
  0x59   : > { %1588 = vmatpush1.bf16.msra.mxu0 %v3041_v19  ;;  %1548 = vmatprep.subr.bf16.mxu1 %v3042_v20  ;;  %v3068_v37 = vld [vmem:[#allocation2 + $0x324] ss:$16 sps:$4 sm:$0xff]   ;;  %v3071_v39 = vld [vmem:[#allocation2 + $0x320] ss:$16 sps:$4 sm:$0xff]   ;;  %v3136_v19 = vld [vmem:[#allocation2 + $0x6c] ss:$16 sps:$4 sm:$0xff]  }
  0x5a   : > { %1589 = vmatprep.subr.bf16.mxu0 %v3044_v21  ;;  %v3072_v40 = vld [vmem:[#allocation2 + $0x144] ss:$16 sps:$4 sm:$0xff]   ;;  %v3076_v42 = vld [vmem:[#allocation2 + $0x140] ss:$16 sps:$4 sm:$0xff]   ;;  %v3134_v21 = vld [vmem:[#allocation2 + $0x68] ss:$16 sps:$4 sm:$0xff]  }
  0x5b   : > { %v3074_v41 = vld [vmem:[#allocation2 + $0x344] ss:$16 sps:$4 sm:$0xff]   ;;  %v3077_v43 = vld [vmem:[#allocation2 + $0x340] ss:$16 sps:$4 sm:$0xff]  }
  0x5c   : > { %1549 = vmatpush1.bf16.msra.mxu1 %v3046_v22  ;;  %v3078_v44 = vld [vmem:[#allocation2 + $0x164] ss:$16 sps:$4 sm:$0xff]   ;;  %v3082_v46 = vld [vmem:[#allocation2 + $0x160] ss:$16 sps:$4 sm:$0xff]  }
  0x5d   : > { %1590 = vmatpush1.bf16.msra.mxu0 %v3047_v23  ;;  %1550 = vmatprep.subr.bf16.mxu1 %v3048_v24  ;;  %v3080_v45 = vld [vmem:[#allocation2 + $0x364] ss:$16 sps:$4 sm:$0xff]   ;;  %v3083_v48 = vld [vmem:[#allocation2 + $0x360] ss:$16 sps:$4 sm:$0xff]   ;;  %v3142_v23 = vld [vmem:[#allocation2 + $0x8c] ss:$16 sps:$4 sm:$0xff]  }
  0x5e   : > { %1591 = vmatprep.subr.bf16.mxu0 %v3050_v25  ;;  %v308_v47 = vld [vmem:[%s3638_s15] sm:$0xff]  ;;  %v3140_v25 = vld [vmem:[#allocation2 + $0x88] ss:$16 sps:$4 sm:$0xff]  }
  0x5f   : > { %v2637_v49 = vcombine.high %v308_v47, %v308_v47  ;;  %v3084_v51 = vld [vmem:[#allocation2 + $0x184] ss:$16 sps:$4 sm:$0xff]   ;;  %v3088_v54 = vld [vmem:[#allocation2 + $0x180] ss:$16 sps:$4 sm:$0xff]   ;;  %v3645_v6 = vcombine.low %v308_v47, %v308_v47  ;;  %v3170_v47 = vld [vmem:[#allocation2 + $0x128] ss:$16 sps:$4 sm:$0xff]  }
  0x60   : > { %1551 = vmatpush1.bf16.msra.mxu1 %v3052_v26  ;;  %v3086_v53 = vld [vmem:[#allocation2 + $0x384] ss:$16 sps:$4 sm:$0xff]   ;;  %v3089_v55 = vld [vmem:[#allocation2 + $0x380] ss:$16 sps:$4 sm:$0xff]  }
  0x61   : > { %1592 = vmatpush1.bf16.msra.mxu0 %v3053_v27  ;;  %1552 = vmatprep.subr.bf16.mxu1 %v3054_v28  ;;  %v3090_v56 = vld [vmem:[#allocation2 + $0x1a4] ss:$16 sps:$4 sm:$0xff]   ;;  %v3094_v58 = vld [vmem:[#allocation2 + $0x1a0] ss:$16 sps:$4 sm:$0xff]   ;;  %v3148_v27 = vld [vmem:[#allocation2 + $0xac] ss:$16 sps:$4 sm:$0xff]  }
  0x62   : > { %1593 = vmatprep.subr.bf16.mxu0 %v3056_v29  ;;  %1570 = vmatprep.mubr.bf16.mxu1 %v2637_v49  ;;  %v3092_v57 = vld [vmem:[#allocation2 + $0x3a4] ss:$16 sps:$4 sm:$0xff]   ;;  %v3095_v59 = vld [vmem:[#allocation2 + $0x3a0] ss:$16 sps:$4 sm:$0xff]   ;;  %v3146_v29 = vld [vmem:[#allocation2 + $0xa8] ss:$16 sps:$4 sm:$0xff]  }
  0x63   : > { %v3096_v60 = vld [vmem:[#allocation2 + $0x1c4] ss:$16 sps:$4 sm:$0xff]   ;;  %v3100_v62 = vld [vmem:[#allocation2 + $0x1c0] ss:$16 sps:$4 sm:$0xff]  }
  0x64   : > { %1553 = vmatpush1.bf16.msra.mxu1 %v3058_v30  ;;  %v3098_v61 = vld [vmem:[#allocation2 + $0x3c4] ss:$16 sps:$4 sm:$0xff]   ;;  %v3101_v63 = vld [vmem:[#allocation2 + $0x3c0] ss:$16 sps:$4 sm:$0xff]  }
  0x65   : > { %1594 = vmatpush1.bf16.msra.mxu0 %v3059_v31  ;;  %1554 = vmatprep.subr.bf16.mxu1 %v3060_v32  ;;  %v3102_v0 = vld [vmem:[#allocation2 + $0x1e4] ss:$16 sps:$4 sm:$0xff]   ;;  %v3106_v2 = vld [vmem:[#allocation2 + $0x1e0] ss:$16 sps:$4 sm:$0xff]   ;;  %v3154_v31 = vld [vmem:[#allocation2 + $0xcc] ss:$16 sps:$4 sm:$0xff]  }
  0x66   : > { %1595 = vmatprep.subr.bf16.mxu0 %v3062_v33  ;;  %v3104_v1 = vld [vmem:[#allocation2 + $0x3e4] ss:$16 sps:$4 sm:$0xff]   ;;  %v3107_v3 = vld [vmem:[#allocation2 + $0x3e0] ss:$16 sps:$4 sm:$0xff]  }
  0x67   : > { %v3115_v4 = vld [vmem:[#allocation2 + $0x404] ss:$16 sps:$4 sm:$0xff]   ;;  %v3113_v8 = vld [vmem:[#allocation2 + $0x400] ss:$16 sps:$4 sm:$0xff]  }
  0x68   : > { %1555 = vmatpush1.bf16.msra.mxu1 %v3064_v34  ;;  %v3121_v10 = vld [vmem:[#allocation2 + $0x424] ss:$16 sps:$4 sm:$0xff]   ;;  %v3119_v12 = vld [vmem:[#allocation2 + $0x420] ss:$16 sps:$4 sm:$0xff]  }
  0x69   : > { %1596 = vmatpush1.bf16.msra.mxu0 %v3065_v35  ;;  %1556 = vmatprep.subr.bf16.mxu1 %v3066_v36  ;;  %v3127_v14 = vld [vmem:[#allocation2 + $0x444] ss:$16 sps:$4 sm:$0xff]   ;;  %v3125_v16 = vld [vmem:[#allocation2 + $0x440] ss:$16 sps:$4 sm:$0xff]   ;;  %v3152_v35 = vld [vmem:[#allocation2 + $0xc8] ss:$16 sps:$4 sm:$0xff]  }
  0x6a   : > { %1597 = vmatprep.subr.bf16.mxu0 %v3068_v37  ;;  %v3133_v18 = vld [vmem:[#allocation2 + $0x464] ss:$16 sps:$4 sm:$0xff]   ;;  %v3131_v20 = vld [vmem:[#allocation2 + $0x460] ss:$16 sps:$4 sm:$0xff]   ;;  %v3160_v37 = vld [vmem:[#allocation2 + $0xec] ss:$16 sps:$4 sm:$0xff]  }
  0x6b   : > { %v3139_v22 = vld [vmem:[#allocation2 + $0x484] ss:$16 sps:$4 sm:$0xff]   ;;  %v3137_v24 = vld [vmem:[#allocation2 + $0x480] ss:$16 sps:$4 sm:$0xff]  }
  0x6c   : > { %1557 = vmatpush1.bf16.msra.mxu1 %v3070_v38  ;;  %v3145_v26 = vld [vmem:[#allocation2 + $0x4a4] ss:$16 sps:$4 sm:$0xff]   ;;  %v3143_v28 = vld [vmem:[#allocation2 + $0x4a0] ss:$16 sps:$4 sm:$0xff]  }
  0x6d   : > { %1598 = vmatpush1.bf16.msra.mxu0 %v3071_v39  ;;  %1558 = vmatprep.subr.bf16.mxu1 %v3072_v40  ;;  %v3151_v30 = vld [vmem:[#allocation2 + $0x4c4] ss:$16 sps:$4 sm:$0xff]   ;;  %v3149_v33 = vld [vmem:[#allocation2 + $0x4c0] ss:$16 sps:$4 sm:$0xff]   ;;  %v3158_v39 = vld [vmem:[#allocation2 + $0xe8] ss:$16 sps:$4 sm:$0xff]  }
  0x6e   : > { %1599 = vmatprep.subr.bf16.mxu0 %v3074_v41  ;;  %v3652_v32 = vld [vmem:[%s3638_s15 + $0x10] sm:$0xff]  ;;  %v3166_v41 = vld [vmem:[#allocation2 + $0x10c] ss:$16 sps:$4 sm:$0xff]  }
  0x6f   : > { %v3656_v34 = vcombine.high %v3652_v32, %v3652_v32  ;;  %v3157_v36 = vld [vmem:[#allocation2 + $0x4e4] ss:$16 sps:$4 sm:$0xff]   ;;  %v3155_v38 = vld [vmem:[#allocation2 + $0x4e0] ss:$16 sps:$4 sm:$0xff]  }
  0x70   : > { %1559 = vmatpush1.bf16.msra.mxu1 %v3076_v42  ;;  %v3163_v40 = vld [vmem:[#allocation2 + $0x504] ss:$16 sps:$4 sm:$0xff]   ;;  %v3161_v42 = vld [vmem:[#allocation2 + $0x500] ss:$16 sps:$4 sm:$0xff]  }
  0x71   : > { %1600 = vmatpush1.bf16.msra.mxu0 %v3077_v43  ;;  %1560 = vmatprep.subr.bf16.mxu1 %v3078_v44  ;;  %v3164_v43 = vld [vmem:[#allocation2 + $0x108] ss:$16 sps:$4 sm:$0xff]   ;;  %v3169_v44 = vld [vmem:[#allocation2 + $0x524] ss:$16 sps:$4 sm:$0xff]   ;;  %v3173_v50 = vld [vmem:[#allocation2 + $0x540] ss:$16 sps:$4 sm:$0xff]  }
  0x72   : > { %1601 = vmatprep.subr.bf16.mxu0 %v3080_v45  ;;  %v3172_v45 = vld [vmem:[#allocation2 + $0x12c] ss:$16 sps:$4 sm:$0xff]  }
  0x74   : > { %1561 = vmatpush1.bf16.msra.mxu1 %v3082_v46  ;;  %v3167_v46 = vld [vmem:[#allocation2 + $0x520] ss:$16 sps:$4 sm:$0xff]  }
  0x75   : > { %1602 = vmatpush1.bf16.msra.mxu0 %v3083_v48  ;;  %1562 = vmatprep.subr.bf16.mxu1 %v3084_v51  ;;  %v3175_v48 = vld [vmem:[#allocation2 + $0x544] ss:$16 sps:$4 sm:$0xff]   ;;  %v3176_v51 = vld [vmem:[#allocation2 + $0x148] ss:$16 sps:$4 sm:$0xff]  }
  0x76   : > { %1603 = vmatprep.subr.bf16.mxu0 %v3086_v53  ;;  %v3181_v53 = vld [vmem:[#allocation2 + $0x564] ss:$16 sps:$4 sm:$0xff]  }
  0x78   : > { %1563 = vmatpush1.bf16.msra.mxu1 %v3088_v54  ;;  %v3184_v54 = vld [vmem:[#allocation2 + $0x16c] ss:$16 sps:$4 sm:$0xff]  }
  0x79   : > { %1604 = vmatpush1.bf16.msra.mxu0 %v3089_v55  ;;  %1564 = vmatprep.subr.bf16.mxu1 %v3090_v56  ;;  %v3179_v55 = vld [vmem:[#allocation2 + $0x560] ss:$16 sps:$4 sm:$0xff]   ;;  %v3182_v56 = vld [vmem:[#allocation2 + $0x168] ss:$16 sps:$4 sm:$0xff]  }
  0x7a   : > { %1605 = vmatprep.subr.bf16.mxu0 %v3092_v57  ;;  %v3187_v57 = vld [vmem:[#allocation2 + $0x584] ss:$16 sps:$4 sm:$0xff]  }
  0x7c   : > { %1565 = vmatpush1.bf16.msra.mxu1 %v3094_v58  ;;  %v3190_v58 = vld [vmem:[#allocation2 + $0x18c] ss:$16 sps:$4 sm:$0xff]  }
  0x7d   : > { %1606 = vmatpush1.bf16.msra.mxu0 %v3095_v59  ;;  %1566 = vmatprep.subr.bf16.mxu1 %v3096_v60  ;;  %v3185_v59 = vld [vmem:[#allocation2 + $0x580] ss:$16 sps:$4 sm:$0xff]   ;;  %v3188_v60 = vld [vmem:[#allocation2 + $0x188] ss:$16 sps:$4 sm:$0xff]  }
  0x7e   : > { %1607 = vmatprep.subr.bf16.mxu0 %v3098_v61  ;;  %v3193_v61 = vld [vmem:[#allocation2 + $0x5a4] ss:$16 sps:$4 sm:$0xff]  }
  0x80   : > { %1567 = vmatpush1.bf16.msra.mxu1 %v3100_v62  ;;  %v3196_v62 = vld [vmem:[#allocation2 + $0x1ac] ss:$16 sps:$4 sm:$0xff]  }
  0x81   : > { %1608 = vmatpush1.bf16.msra.mxu0 %v3101_v63  ;;  %1568 = vmatprep.subr.bf16.mxu1 %v3102_v0  ;;  %v3191_v63 = vld [vmem:[#allocation2 + $0x5a0] ss:$16 sps:$4 sm:$0xff]   ;;  %v3194_v0 = vld [vmem:[#allocation2 + $0x1a8] ss:$16 sps:$4 sm:$0xff]  }
  0x82   : > { %1609 = vmatprep.subr.bf16.mxu0 %v3104_v1  ;;  %v3199_v1 = vld [vmem:[#allocation2 + $0x5c4] ss:$16 sps:$4 sm:$0xff]  }
  0x84   : > { %1569 = vmatpush1.bf16.msra.mxu1 %v3106_v2  ;;  %v3202_v2 = vld [vmem:[#allocation2 + $0x1cc] ss:$16 sps:$4 sm:$0xff]  }
  0x85   : > { %1610 = vmatpush1.bf16.msra.mxu0 %v3107_v3  ;;  %1702 = vmatprep.subr.bf16.mxu1 %v3118_v5  ;;  %v3197_v3 = vld [vmem:[#allocation2 + $0x5c0] ss:$16 sps:$4 sm:$0xff]   ;;  %v3205_v5 = vld [vmem:[#allocation2 + $0x5e4] ss:$16 sps:$4 sm:$0xff]  }
  0x86   : > { %1620 = vmatprep.subr.bf16.mxu0 %v3115_v4  ;;  %v3200_v4 = vld [vmem:[#allocation2 + $0x1c8] ss:$16 sps:$4 sm:$0xff]  }
  0x87   : > { %1571 = vmatmul.mubr.bf16.vlgmr.msra.gmra.mrb[0].mxu1 %v3645_v6 }
  0x88   : > { %1612 = vmatmul.mubr.bf16.vlgmr.msra.gmra.mrb[0].mxu0 %v3647_v7  ;;  %1703 = vmatpush1.bf16.msra.mxu1 %v3116_v9  ;;  %v3203_v9 = vld [vmem:[#allocation2 + $0x5e0] ss:$16 sps:$4 sm:$0xff]  }
  0x89   : > { %1621 = vmatpush1.bf16.msra.mxu0 %v3113_v8  ;;  %1704 = vmatprep.subr.bf16.mxu1 %v3124_v11  ;;  %v3208_v8 = vld [vmem:[#allocation2 + $0x1ec] ss:$16 sps:$4 sm:$0xff]  }
  0x8a   : > { %1622 = vmatprep.subr.bf16.mxu0 %v3121_v10  ;;  %1734 = vmatprep.mubr.bf16.mxu1 %v2637_v49  ;;  %v3178_v49 = vld [vmem:[#allocation2 + $0x14c] ss:$16 sps:$4 sm:$0xff]   ;;  %v3206_v10 = vld [vmem:[#allocation2 + $0x1e8] ss:$16 sps:$4 sm:$0xff]  }
  0x8b   : > { %1652 = vmatprep.mubr.bf16.mxu0 %v3656_v34  ;;  %v3213_v11 = vld [vmem:[#allocation2 + $0x20c] ss:$16 sps:$4 sm:$0xff]  }
  0x8c   : > { %1705 = vmatpush1.bf16.msra.mxu1 %v3122_v13  ;;  %v3661_v13 = vcombine.low %v3652_v32, %v3652_v32  ;;  %v3315_v32 = vld [vmem:[#allocation4 + $0x4] ss:$8 sps:$4 sm:$0xff]  }
  0x8d   : > { %1623 = vmatpush1.bf16.msra.mxu0 %v3119_v12  ;;  %1706 = vmatprep.subr.bf16.mxu1 %v3130_v15  ;;  %v3219_v12 = vld [vmem:[#allocation2 + $0x604] ss:$16 sps:$4 sm:$0xff]   ;;  %v3217_v15 = vld [vmem:[#allocation2 + $0x600] ss:$16 sps:$4 sm:$0xff]  }
  0x8e   : > { %1624 = vmatprep.subr.bf16.mxu0 %v3127_v14  ;;  %v3211_v14 = vld [vmem:[#allocation2 + $0x208] ss:$16 sps:$4 sm:$0xff]  }
  0x90   : > { %1707 = vmatpush1.bf16.msra.mxu1 %v3128_v17  ;;  %v3309_v17 = vld [vmem:[#allocation2 + $0x60c] ss:$16 sps:$4 sm:$0xff]  }
  0x91   : > { %1625 = vmatpush1.bf16.msra.mxu0 %v3125_v16  ;;  %1708 = vmatprep.subr.bf16.mxu1 %v3136_v19  ;;  %v3216_v16 = vld [vmem:[#allocation2 + $0x22c] ss:$16 sps:$4 sm:$0xff]  }
  0x92   : > { %1626 = vmatprep.subr.bf16.mxu0 %v3133_v18  ;;  %v3214_v18 = vld [vmem:[#allocation2 + $0x228] ss:$16 sps:$4 sm:$0xff]   ;;  %v3222_v19 = vld [vmem:[#allocation2 + $0x24c] ss:$16 sps:$4 sm:$0xff]  }
  0x94   : > { %1709 = vmatpush1.bf16.msra.mxu1 %v3134_v21  ;;  %v3220_v21 = vld [vmem:[#allocation2 + $0x248] ss:$16 sps:$4 sm:$0xff]  }
  0x95   : > { %1627 = vmatpush1.bf16.msra.mxu0 %v3131_v20  ;;  %1710 = vmatprep.subr.bf16.mxu1 %v3142_v23  ;;  %v3507_v20 = vmov 0   ;;  %v3110_v23 = vld [vmem:[%s3638_s15 + $0x18] ss:$0 sps:$4 sm:$0xff]   ;;  %s306_s15 = scalar_lea.vmem %s3767_s7, %s2635_s28 }
  0x96   : > { %1628 = vmatprep.subr.bf16.mxu0 %v3139_v22  ;;  %v3225_v22 = vld [vmem:[#allocation2 + $0x26c] ss:$16 sps:$4 sm:$0xff]  }
  0x98   : > { %1711 = vmatpush1.bf16.msra.mxu1 %v3140_v25  ;;  %v3307_v25 = vld [vmem:[#allocation2 + $0x608] ss:$16 sps:$4 sm:$0xff]  }
  0x99   : > { %1629 = vmatpush1.bf16.msra.mxu0 %v3137_v24  ;;  %1712 = vmatprep.subr.bf16.mxu1 %v3148_v27  ;;  %v3223_v24 = vld [vmem:[#allocation2 + $0x268] ss:$16 sps:$4 sm:$0xff]   ;;  %v3231_v27 = vld [vmem:[#allocation2 + $0x2ac] ss:$16 sps:$4 sm:$0xff]  }
  0x9a   : > { %1630 = vmatprep.subr.bf16.mxu0 %v3145_v26  ;;  %v3228_v26 = vld [vmem:[#allocation2 + $0x28c] ss:$16 sps:$4 sm:$0xff]  }
  0x9c   : > { %1713 = vmatpush1.bf16.msra.mxu1 %v3146_v29  ;;  %v3232_v29 = vld [vmem:[#allocation2 + $0x2c8] ss:$16 sps:$4 sm:$0xff]  }
  0x9d   : > { %1631 = vmatpush1.bf16.msra.mxu0 %v3143_v28  ;;  %1714 = vmatprep.subr.bf16.mxu1 %v3154_v31  ;;  %v3229_v28 = vld [vmem:[#allocation2 + $0x2a8] ss:$16 sps:$4 sm:$0xff]  }
  0x9e   : > { %1632 = vmatprep.subr.bf16.mxu0 %v3151_v30  ;;  %v3237_v30 = vld [vmem:[#allocation2 + $0x2ec] ss:$16 sps:$4 sm:$0xff]   ;;  %v3313_v31 = vld [vmem:[#allocation4] ss:$8 sps:$4 sm:$0xff]  }
  0xa0   : > { %1715 = vmatpush1.bf16.msra.mxu1 %v3152_v35  ;;  %v3235_v35 = vld [vmem:[#allocation2 + $0x2e8] ss:$16 sps:$4 sm:$0xff]  }
  0xa1   : > { %1633 = vmatpush1.bf16.msra.mxu0 %v3149_v33  ;;  %1716 = vmatprep.subr.bf16.mxu1 %v3160_v37  ;;  %v3318_v33 = vld [vmem:[#allocation4 + $0x14] ss:$8 sps:$4 sm:$0xff]  }
  0xa2   : > { %1634 = vmatprep.subr.bf16.mxu0 %v3157_v36  ;;  %v3316_v36 = vld [vmem:[#allocation4 + $0x10] ss:$8 sps:$4 sm:$0xff]   ;;  %v3240_v37 = vld [vmem:[#allocation2 + $0x30c] ss:$16 sps:$4 sm:$0xff]  }
  0xa4   : > { %1717 = vmatpush1.bf16.msra.mxu1 %v3158_v39  ;;  %v3238_v39 = vld [vmem:[#allocation2 + $0x308] ss:$16 sps:$4 sm:$0xff]  }
  0xa5   : > { %1635 = vmatpush1.bf16.msra.mxu0 %v3155_v38  ;;  %1718 = vmatprep.subr.bf16.mxu1 %v3166_v41  ;;  %v3321_v38 = vld [vmem:[#allocation4 + $0x24] ss:$8 sps:$4 sm:$0xff]  }
  0xa6   : > { %1636 = vmatprep.subr.bf16.mxu0 %v3163_v40  ;;  %v3319_v40 = vld [vmem:[#allocation4 + $0x20] ss:$8 sps:$4 sm:$0xff]   ;;  %v3243_v41 = vld [vmem:[#allocation2 + $0x32c] ss:$16 sps:$4 sm:$0xff]  }
  0xa8   : > { %1719 = vmatpush1.bf16.msra.mxu1 %v3164_v43  ;;  %v3241_v43 = vld [vmem:[#allocation2 + $0x328] ss:$16 sps:$4 sm:$0xff]  }
  0xa9   : > { %1637 = vmatpush1.bf16.msra.mxu0 %v3161_v42  ;;  %1720 = vmatprep.subr.bf16.mxu1 %v3172_v45  ;;  %v3324_v42 = vld [vmem:[#allocation4 + $0x34] ss:$8 sps:$4 sm:$0xff]  }
  0xaa   : > { %1638 = vmatprep.subr.bf16.mxu0 %v3169_v44  ;;  %v3322_v44 = vld [vmem:[#allocation4 + $0x30] ss:$8 sps:$4 sm:$0xff]   ;;  %v3246_v45 = vld [vmem:[#allocation2 + $0x34c] ss:$16 sps:$4 sm:$0xff]  }
  0xac   : > { %1721 = vmatpush1.bf16.msra.mxu1 %v3170_v47  ;;  %v3244_v47 = vld [vmem:[#allocation2 + $0x348] ss:$16 sps:$4 sm:$0xff]  }
  0xad   : > { %1639 = vmatpush1.bf16.msra.mxu0 %v3167_v46  ;;  %1722 = vmatprep.subr.bf16.mxu1 %v3178_v49  ;;  %v3327_v46 = vld [vmem:[#allocation4 + $0x44] ss:$8 sps:$4 sm:$0xff]  }
  0xae   : > { %1640 = vmatprep.subr.bf16.mxu0 %v3175_v48  ;;  %v3325_v48 = vld [vmem:[#allocation4 + $0x40] ss:$8 sps:$4 sm:$0xff]   ;;  %v3249_v49 = vld [vmem:[#allocation2 + $0x36c] ss:$16 sps:$4 sm:$0xff]  }
  0xb0   : > { %1723 = vmatpush1.bf16.msra.mxu1 %v3176_v51  ;;  %v3247_v51 = vld [vmem:[#allocation2 + $0x368] ss:$16 sps:$4 sm:$0xff]  }
  0xb1   : > { %1641 = vmatpush1.bf16.msra.mxu0 %v3173_v50  ;;  %1724 = vmatprep.subr.bf16.mxu1 %v3184_v54  ;;  %v3330_v50 = vld [vmem:[#allocation4 + $0x54] ss:$8 sps:$4 sm:$0xff]  }
  0xb2   : > { %1642 = vmatprep.subr.bf16.mxu0 %v3181_v53  ;;  %v3328_v53 = vld [vmem:[#allocation4 + $0x50] ss:$8 sps:$4 sm:$0xff]   ;;  %v3252_v54 = vld [vmem:[#allocation2 + $0x38c] ss:$16 sps:$4 sm:$0xff]  }
  0xb4   : > { %1725 = vmatpush1.bf16.msra.mxu1 %v3182_v56  ;;  %v3250_v56 = vld [vmem:[#allocation2 + $0x388] ss:$16 sps:$4 sm:$0xff]  }
  0xb5   : > { %1643 = vmatpush1.bf16.msra.mxu0 %v3179_v55  ;;  %1726 = vmatprep.subr.bf16.mxu1 %v3190_v58  ;;  %v3333_v55 = vld [vmem:[#allocation4 + $0x64] ss:$8 sps:$4 sm:$0xff]  }
  0xb6   : > { %1644 = vmatprep.subr.bf16.mxu0 %v3187_v57  ;;  %v3331_v57 = vld [vmem:[#allocation4 + $0x60] ss:$8 sps:$4 sm:$0xff]   ;;  %v3255_v58 = vld [vmem:[#allocation2 + $0x3ac] ss:$16 sps:$4 sm:$0xff]  }
  0xb8   : > { %1727 = vmatpush1.bf16.msra.mxu1 %v3188_v60  ;;  %v3253_v60 = vld [vmem:[#allocation2 + $0x3a8] ss:$16 sps:$4 sm:$0xff]  }
  0xb9   : > { %1645 = vmatpush1.bf16.msra.mxu0 %v3185_v59  ;;  %1728 = vmatprep.subr.bf16.mxu1 %v3196_v62  ;;  %v3336_v59 = vld [vmem:[#allocation4 + $0x74] ss:$8 sps:$4 sm:$0xff]  }
  0xba   : > { %1646 = vmatprep.subr.bf16.mxu0 %v3193_v61  ;;  %v3334_v61 = vld [vmem:[#allocation4 + $0x70] ss:$8 sps:$4 sm:$0xff]   ;;  %v3258_v62 = vld [vmem:[#allocation2 + $0x3cc] ss:$16 sps:$4 sm:$0xff]  }
  0xbc   : > { %1729 = vmatpush1.bf16.msra.mxu1 %v3194_v0  ;;  %v3256_v0 = vld [vmem:[#allocation2 + $0x3c8] ss:$16 sps:$4 sm:$0xff]  }
  0xbd   : > { %1647 = vmatpush1.bf16.msra.mxu0 %v3191_v63  ;;  %1730 = vmatprep.subr.bf16.mxu1 %v3202_v2  ;;  %v3339_v63 = vld [vmem:[#allocation4 + $0x84] ss:$8 sps:$4 sm:$0xff]  }
  0xbe   : > { %1648 = vmatprep.subr.bf16.mxu0 %v3199_v1  ;;  %v3337_v1 = vld [vmem:[#allocation4 + $0x80] ss:$8 sps:$4 sm:$0xff]   ;;  %v3261_v2 = vld [vmem:[#allocation2 + $0x3ec] ss:$16 sps:$4 sm:$0xff]  }
  0xc0   : > { %1731 = vmatpush1.bf16.msra.mxu1 %v3200_v4  ;;  %v3259_v4 = vld [vmem:[#allocation2 + $0x3e8] ss:$16 sps:$4 sm:$0xff]  }
  0xc1   : > { %1649 = vmatpush1.bf16.msra.mxu0 %v3197_v3  ;;  %1732 = vmatprep.subr.bf16.mxu1 %v3208_v8  ;;  %v3342_v3 = vld [vmem:[#allocation4 + $0x94] ss:$8 sps:$4 sm:$0xff]  }
  0xc2   : > { %1650 = vmatprep.subr.bf16.mxu0 %v3205_v5  ;;  %v3340_v5 = vld [vmem:[#allocation4 + $0x90] ss:$8 sps:$4 sm:$0xff]   ;;  %v3264_v8 = vld [vmem:[#allocation2 + $0x40c] ss:$16 sps:$4 sm:$0xff]  }
  0xc4   : > { %1733 = vmatpush1.bf16.msra.mxu1 %v3206_v10  ;;  %v3262_v10 = vld [vmem:[#allocation2 + $0x408] ss:$16 sps:$4 sm:$0xff]  }
  0xc5   : > { %1651 = vmatpush1.bf16.msra.mxu0 %v3203_v9  ;;  %1743 = vmatprep.subr.bf16.mxu1 %v3213_v11  ;;  %v3345_v9 = vld [vmem:[#allocation4 + $0xa4] ss:$8 sps:$4 sm:$0xff]  }
  0xc6   : > { %1661 = vmatprep.subr.bf16.mxu0 %v3219_v12  ;;  %v3267_v11 = vld [vmem:[#allocation2 + $0x42c] ss:$16 sps:$4 sm:$0xff]   ;;  %v3343_v12 = vld [vmem:[#allocation4 + $0xa0] ss:$8 sps:$4 sm:$0xff]  }
  0xc7   : > { %1735 = vmatmul.mubr.bf16.vlgmr.msra.gmra.mrb[4].mxu1 %v3645_v6  ;;  %v3226_v6 = vld [vmem:[#allocation2 + $0x288] ss:$16 sps:$4 sm:$0xff]  }
  0xc8   : > { %1653 = vmatmul.mubr.bf16.vlgmr.msra.gmra.mrb[0].mxu0 %v3661_v13  ;;  %1744 = vmatpush1.bf16.msra.mxu1 %v3211_v14  ;;  %v3348_v14 = vld [vmem:[#allocation4 + $0xb4] ss:$8 sps:$4 sm:$0xff]  }
  0xc9   : > { %1662 = vmatpush1.bf16.msra.mxu0 %v3217_v15  ;;  %1745 = vmatprep.subr.bf16.mxu1 %v3216_v16  ;;  %v3265_v15 = vld [vmem:[#allocation2 + $0x428] ss:$16 sps:$4 sm:$0xff]   ;;  %v3270_v16 = vld [vmem:[#allocation2 + $0x44c] ss:$16 sps:$4 sm:$0xff]  }
  0xca   : > { %1693 = vmatprep.mubr.bf16.mxu0 %v3507_v20  ;;  %1775 = vmatprep.mubr.bf16.mxu1 %v3642_v52  ;;  %v3234_v52 = vld [vmem:[#allocation2 + $0x2cc] ss:$16 sps:$4 sm:$0xff]  }
  0xcb   : > { %1825 = vmatprep.subr.bf16.mxu0 %v3309_v17  ;;  %v3346_v17 = vld [vmem:[#allocation4 + $0xb0] ss:$8 sps:$4 sm:$0xff]  }
  0xcc   : > { %1746 = vmatpush1.bf16.msra.mxu1 %v3214_v18  ;;  %v3351_v18 = vld [vmem:[#allocation4 + $0xc4] ss:$8 sps:$4 sm:$0xff]  }
  0xcd   : > { %1747 = vmatprep.subr.bf16.mxu1 %v3222_v19  ;;  %v3268_v19 = vld [vmem:[#allocation2 + $0x448] ss:$16 sps:$4 sm:$0xff]  }
  0xd0   : > { %1748 = vmatpush1.bf16.msra.mxu1 %v3220_v21  ;;  %v3349_v21 = vld [vmem:[#allocation4 + $0xc0] ss:$8 sps:$4 sm:$0xff]  }
  0xd1   : > { %1749 = vmatprep.subr.bf16.mxu1 %v3225_v22  ;;  %v3354_v22 = vld [vmem:[#allocation4 + $0xd4] ss:$8 sps:$4 sm:$0xff]  }
  0xd4   : > { %2839 = vmatmul.mubr.msk.bf16.vlgmr.msra.gmra.mrb[0].mxu0 %vm1534_vm0, %v3110_v23  ;;  %1750 = vmatpush1.bf16.msra.mxu1 %v3223_v24  ;;  %v3274_v24 = vld [vmem:[#allocation2 + $0x488] ss:$16 sps:$4 sm:$0xff]  }
  0xd5   : > { %1826 = vmatpush1.bf16.msra.mxu0 %v3307_v25  ;;  %1751 = vmatprep.subr.bf16.mxu1 %v3228_v26  ;;  %v3279_v25 = vld [vmem:[#allocation2 + $0x4ac] ss:$16 sps:$4 sm:$0xff]   ;;  %v3277_v26 = vld [vmem:[#allocation2 + $0x4a8] ss:$16 sps:$4 sm:$0xff]  }
  0xd6   : > { %1857 = vmatprep.mubr.bf16.mxu0 %v3507_v20  ;;  %2278 = vmatprep.subr.bf16.mxu0 %v3315_v32  ;;  %v3273_v20 = vld [vmem:[#allocation2 + $0x46c] ss:$16 sps:$4 sm:$0xff]  }
  0xd7   : > { %v3357_v32 = vld [vmem:[#allocation4 + $0xe4] ss:$8 sps:$4 sm:$0xff]  }
  0xd8   : > { %1752 = vmatpush1.bf16.msra.mxu1 %v3226_v6  ;;  %v3282_v6 = vld [vmem:[#allocation2 + $0x4cc] ss:$16 sps:$4 sm:$0xff]  }
  0xd9   : > { %1753 = vmatprep.subr.bf16.mxu1 %v3231_v27  ;;  %v3280_v27 = vld [vmem:[#allocation2 + $0x4c8] ss:$16 sps:$4 sm:$0xff]  }
  0xdc   : > { %2840 = vmatmul.mubr.msk.bf16.vlgmr.msra.gmra.mrb[4].mxu0 %vm1534_vm0, %v3110_v23  ;;  %1754 = vmatpush1.bf16.msra.mxu1 %v3229_v28  ;;  %v3276_v23 = vld [vmem:[#allocation2 + $0x48c] ss:$16 sps:$4 sm:$0xff]  }
  0xdd   : > { %1755 = vmatprep.subr.bf16.mxu1 %v3234_v52  ;;  %2279 = vmatpush1.bf16.msra.mxu0 %v3313_v31  ;;  %v3285_v28 = vld [vmem:[#allocation2 + $0x4ec] ss:$16 sps:$4 sm:$0xff]   ;;  %v3283_v52 = vld [vmem:[#allocation2 + $0x4e8] ss:$16 sps:$4 sm:$0xff]  }
  0xde   : > { %2280 = vmatprep.subr.bf16.mxu0 %v3318_v33  ;;  %v3291_v31 = vld [vmem:[#allocation2 + $0x52c] ss:$16 sps:$4 sm:$0xff]   ;;  %v3355_v33 = vld [vmem:[#allocation4 + $0xe0] ss:$8 sps:$4 sm:$0xff]  }
  0xe0   : > { %1756 = vmatpush1.bf16.msra.mxu1 %v3232_v29  ;;  %v3288_v29 = vld [vmem:[#allocation2 + $0x50c] ss:$16 sps:$4 sm:$0xff]  }
  0xe1   : > { %1757 = vmatprep.subr.bf16.mxu1 %v3237_v30  ;;  %2281 = vmatpush1.bf16.msra.mxu0 %v3316_v36  ;;  %v3286_v30 = vld [vmem:[#allocation2 + $0x508] ss:$16 sps:$4 sm:$0xff]   ;;  %v3294_v36 = vld [vmem:[#allocation2 + $0x54c] ss:$16 sps:$4 sm:$0xff]  }
  0xe2   : > { %2282 = vmatprep.subr.bf16.mxu0 %v3321_v38  ;;  %v3358_v38 = vld [vmem:[#allocation4 + $0xf0] ss:$8 sps:$4 sm:$0xff]  }
  0xe4   : > { %1758 = vmatpush1.bf16.msra.mxu1 %v3235_v35  ;;  %v3289_v35 = vld [vmem:[#allocation2 + $0x528] ss:$16 sps:$4 sm:$0xff]  }
  0xe5   : > { %1759 = vmatprep.subr.bf16.mxu1 %v3240_v37  ;;  %2283 = vmatpush1.bf16.msra.mxu0 %v3319_v40  ;;  %v3360_v37 = vld [vmem:[#allocation4 + $0xf4] ss:$8 sps:$4 sm:$0xff]  }
  0xe6   : > { %2284 = vmatprep.subr.bf16.mxu0 %v3324_v42  ;;  %v3297_v40 = vld [vmem:[#allocation2 + $0x56c] ss:$16 sps:$4 sm:$0xff]  }
  0xe7   : > { %v3363_v42 = vld [vmem:[#allocation4 + $0x104] ss:$8 sps:$4 sm:$0xff]  }
  0xe8   : > { %1760 = vmatpush1.bf16.msra.mxu1 %v3238_v39  ;;  %v3292_v39 = vld [vmem:[#allocation2 + $0x548] ss:$16 sps:$4 sm:$0xff]  }
  0xe9   : > { %1761 = vmatprep.subr.bf16.mxu1 %v3243_v41  ;;  %2285 = vmatpush1.bf16.msra.mxu0 %v3322_v44  ;;  %v3295_v41 = vld [vmem:[#allocation2 + $0x568] ss:$16 sps:$4 sm:$0xff]  }
  0xea   : > { %2286 = vmatprep.subr.bf16.mxu0 %v3327_v46  ;;  %v3298_v44 = vld [vmem:[#allocation2 + $0x588] ss:$16 sps:$4 sm:$0xff]  }
  0xeb   : > { %v3301_v46 = vld [vmem:[#allocation2 + $0x5a8] ss:$16 sps:$4 sm:$0xff]  }
  0xec   : > { %1762 = vmatpush1.bf16.msra.mxu1 %v3241_v43  ;;  %v3300_v43 = vld [vmem:[#allocation2 + $0x58c] ss:$16 sps:$4 sm:$0xff]  }
  0xed   : > { %1763 = vmatprep.subr.bf16.mxu1 %v3246_v45  ;;  %2287 = vmatpush1.bf16.msra.mxu0 %v3325_v48  ;;  %v3303_v45 = vld [vmem:[#allocation2 + $0x5ac] ss:$16 sps:$4 sm:$0xff]   ;;  %v3304_v48 = vld [vmem:[#allocation2 + $0x5c8] ss:$16 sps:$4 sm:$0xff]  }
  0xee   : > { %2288 = vmatprep.subr.bf16.mxu0 %v3330_v50  ;;  %v3310_v50 = vld [vmem:[#allocation2 + $0x5e8] ss:$16 sps:$4 sm:$0xff]  }
  0xf0   : > { %1764 = vmatpush1.bf16.msra.mxu1 %v3244_v47  ;;  %v3306_v47 = vld [vmem:[#allocation2 + $0x5cc] ss:$16 sps:$4 sm:$0xff]  }
  0xf1   : > { %1765 = vmatprep.subr.bf16.mxu1 %v3249_v49  ;;  %2289 = vmatpush1.bf16.msra.mxu0 %v3328_v53  ;;  %v3312_v49 = vld [vmem:[#allocation2 + $0x5ec] ss:$16 sps:$4 sm:$0xff]  }
  0xf2   : > { %2290 = vmatprep.subr.bf16.mxu0 %v3333_v55 }
  0xf4   : > { %1766 = vmatpush1.bf16.msra.mxu1 %v3247_v51 }
  0xf5   : > { %1767 = vmatprep.subr.bf16.mxu1 %v3252_v54  ;;  %2291 = vmatpush1.bf16.msra.mxu0 %v3331_v57 }
  0xf6   : > { %2292 = vmatprep.subr.bf16.mxu0 %v3336_v59  ;;  %v3676_v59 = vld [vmem:[%s3762_s2] sm:$0xf] }
  0xf8   : > { %1768 = vmatpush1.bf16.msra.mxu1 %v3250_v56  ;;  %v510_v56 = vlaneseq }
  0xf9   : > { %1769 = vmatprep.subr.bf16.mxu1 %v3255_v58  ;;  %2293 = vmatpush1.bf16.msra.mxu0 %v3334_v61 }
  0xfa   : > { %2294 = vmatprep.subr.bf16.mxu0 %v3339_v63  ;;  %v3670_v57 = vshrl.u32 %v510_v56, 7  ;;  %v3405_v56 = vld [vmem:[#allocation4 + $0x1e4] ss:$8 sps:$4 sm:$0xff]  }
  0xfc   : > { %1770 = vmatpush1.bf16.msra.mxu1 %v3253_v60  ;;  %v512_v58 = vsub.s32 0, %v3670_v57  ;;  %v516_v60 = vsub.s32 1, %v3670_v57 }
  0xfd   : > { %1771 = vmatprep.subr.bf16.mxu1 %v3258_v62  ;;  %2295 = vmatpush1.bf16.msra.mxu0 %v3337_v1  ;;  %v3409_v1 = vld [vmem:[%s3765_s5 + $0x40] sm:$0xff]  }
  0xfe   : > { %2296 = vmatprep.subr.bf16.mxu0 %v3342_v3  ;;  %v517_v61 = vrot.slane %v3676_v59, %v516_v60  ;;  %v3411_v3 = vld [vmem:[%s3765_s5 + $0x48] sm:$0xff]  }
 0x100   : > { %1772 = vmatpush1.bf16.msra.mxu1 %v3256_v0 }
 0x101   : > { %1773 = vmatprep.subr.bf16.mxu1 %v3261_v2  ;;  %2297 = vmatpush1.bf16.msra.mxu0 %v3340_v5  ;;  %v3410_v2 = vld [vmem:[%s3765_s5] sm:$0xff]  }
 0x102   : > { %2298 = vmatprep.subr.bf16.mxu0 %v3345_v9 }
 0x104   : > { %1774 = vmatpush1.bf16.msra.mxu1 %v3259_v4 }
 0x105   : > { %1784 = vmatprep.subr.bf16.mxu1 %v3264_v8  ;;  %2299 = vmatpush1.bf16.msra.mxu0 %v3343_v12  ;;  %v3412_v12 = vld [vmem:[%s3765_s5 + $0x8] sm:$0xff]  }
 0x106   : > { %2300 = vmatprep.subr.bf16.mxu0 %v3348_v14 }
 0x107   : > { %1776 = vmatmul.mubr.bf16.vlgmr.msra.gmra.mrb[4].mxu1 %v3647_v7  ;;  %v3271_v7 = vld [vmem:[#allocation2 + $0x468] ss:$16 sps:$4 sm:$0xff]  }
 0x108   : > { %1785 = vmatpush1.bf16.msra.mxu1 %v3262_v10  ;;  %1816 = vmatprep.mubr.bf16.mxu1 %v3656_v34  ;;  %v3352_v34 = vld [vmem:[#allocation4 + $0xd0] ss:$8 sps:$4 sm:$0xff]  }
 0x109   : > { %1786 = vmatprep.subr.bf16.mxu1 %v3267_v11  ;;  %2301 = vmatpush1.bf16.msra.mxu0 %v3346_v17 }
 0x10a   : > { %2302 = vmatprep.subr.bf16.mxu0 %v3351_v18 }
 0x10c   : > { %1787 = vmatpush1.bf16.msra.mxu1 %v3265_v15  ;;  %v3413_v15 = vld [vmem:[%s3765_s5 + $0x50] sm:$0xff]  }
 0x10d   : > { %1788 = vmatprep.subr.bf16.mxu1 %v3270_v16  ;;  %2303 = vmatpush1.bf16.msra.mxu0 %v3349_v21 }
 0x10e   : > { %2304 = vmatprep.subr.bf16.mxu0 %v3354_v22  ;;  %v3366_v22 = vld [vmem:[#allocation4 + $0x114] ss:$8 sps:$4 sm:$0xff]  }
 0x110   : > { %1789 = vmatpush1.bf16.msra.mxu1 %v3268_v19  ;;  %v3361_v19 = vld [vmem:[#allocation4 + $0x100] ss:$8 sps:$4 sm:$0xff]  }
 0x111   : > { %1790 = vmatprep.subr.bf16.mxu1 %v3273_v20  ;;  %2305 = vmatpush1.bf16.msra.mxu0 %v3352_v34  ;;  %v3414_v20 = vld [vmem:[%s3765_s5 + $0x10] sm:$0xff]  }
 0x112   : > { %2306 = vmatprep.subr.bf16.mxu0 %v3357_v32  ;;  %v3370_v32 = vld [vmem:[#allocation4 + $0x130] ss:$8 sps:$4 sm:$0xff]  }
 0x114   : > { %1791 = vmatpush1.bf16.msra.mxu1 %v3271_v7 }
 0x115   : > { %1792 = vmatprep.subr.bf16.mxu1 %v3276_v23  ;;  %2307 = vmatpush1.bf16.msra.mxu0 %v3355_v33  ;;  %v3415_v23 = vld [vmem:[%s3765_s5 + $0x58] sm:$0xff]   ;;  %v3420_v33 = vld [vmem:[%s3765_s5 + $0x28] sm:$0xff]  }
 0x116   : > { %2308 = vmatprep.subr.bf16.mxu0 %v3360_v37  ;;  %v3378_v37 = vld [vmem:[#allocation4 + $0x154] ss:$8 sps:$4 sm:$0xff]  }
 0x118   : > { %1793 = vmatpush1.bf16.msra.mxu1 %v3274_v24 }
 0x119   : > { %1794 = vmatprep.subr.bf16.mxu1 %v3279_v25  ;;  %2309 = vmatpush1.bf16.msra.mxu0 %v3358_v38  ;;  %v3364_v25 = vld [vmem:[#allocation4 + $0x110] ss:$8 sps:$4 sm:$0xff]  }
 0x11a   : > { %2319 = vmatprep.subr.bf16.mxu0 %v3363_v42  ;;  %v3376_v38 = vld [vmem:[#allocation4 + $0x150] ss:$8 sps:$4 sm:$0xff]  }
 0x11b   : > { %v3382_v42 = vld [vmem:[#allocation4 + $0x170] ss:$8 sps:$4 sm:$0xff]  }
 0x11c   : > { %1795 = vmatpush1.bf16.msra.mxu1 %v3277_v26 }
 0x11d   : > { %1796 = vmatprep.subr.bf16.mxu1 %v3282_v6  ;;  %v3416_v6 = vld [vmem:[%s3765_s5 + $0x18] sm:$0xff]  }
 0x120   : > { %1797 = vmatpush1.bf16.msra.mxu1 %v3280_v27  ;;  %v3369_v27 = vld [vmem:[#allocation4 + $0x124] ss:$8 sps:$4 sm:$0xff]  }
 0x121   : > { %1798 = vmatprep.subr.bf16.mxu1 %v3285_v28  ;;  %v3417_v28 = vld [vmem:[%s3765_s5 + $0x60] sm:$0xff]  }
 0x124   : > { %1799 = vmatpush1.bf16.msra.mxu1 %v3283_v52  ;;  %v3367_v52 = vld [vmem:[#allocation4 + $0x120] ss:$8 sps:$4 sm:$0xff]  }
 0x125   : > { %1800 = vmatprep.subr.bf16.mxu1 %v3288_v29  ;;  %v3418_v29 = vld [vmem:[%s3765_s5 + $0x20] sm:$0xff]  }
 0x128   : > { %1801 = vmatpush1.bf16.msra.mxu1 %v3286_v30  ;;  %v3372_v30 = vld [vmem:[#allocation4 + $0x134] ss:$8 sps:$4 sm:$0xff]  }
 0x129   : > { %1802 = vmatprep.subr.bf16.mxu1 %v3291_v31  ;;  %v3419_v31 = vld [vmem:[%s3765_s5 + $0x68] sm:$0xff]  }
 0x12c   : > { %1803 = vmatpush1.bf16.msra.mxu1 %v3289_v35  ;;  %v3375_v35 = vld [vmem:[#allocation4 + $0x144] ss:$8 sps:$4 sm:$0xff]  }
 0x12d   : > { %1804 = vmatprep.subr.bf16.mxu1 %v3294_v36  ;;  %v3373_v36 = vld [vmem:[#allocation4 + $0x140] ss:$8 sps:$4 sm:$0xff]  }
 0x130   : > { %1805 = vmatpush1.bf16.msra.mxu1 %v3292_v39  ;;  %v3381_v39 = vld [vmem:[#allocation4 + $0x164] ss:$8 sps:$4 sm:$0xff]  }
 0x131   : > { %1806 = vmatprep.subr.bf16.mxu1 %v3297_v40  ;;  %v3379_v40 = vld [vmem:[#allocation4 + $0x160] ss:$8 sps:$4 sm:$0xff]  }
 0x134   : > { %1807 = vmatpush1.bf16.msra.mxu1 %v3295_v41  ;;  %v3384_v41 = vld [vmem:[#allocation4 + $0x174] ss:$8 sps:$4 sm:$0xff]  }
 0x135   : > { %1808 = vmatprep.subr.bf16.mxu1 %v3300_v43  ;;  %v3387_v43 = vld [vmem:[#allocation4 + $0x184] ss:$8 sps:$4 sm:$0xff]  }
 0x138   : > { %1809 = vmatpush1.bf16.msra.mxu1 %v3298_v44  ;;  %v3385_v44 = vld [vmem:[#allocation4 + $0x180] ss:$8 sps:$4 sm:$0xff]  }
 0x139   : > { %1810 = vmatprep.subr.bf16.mxu1 %v3303_v45  ;;  %v3390_v45 = vld [vmem:[#allocation4 + $0x194] ss:$8 sps:$4 sm:$0xff]  }
 0x13c   : > { %1811 = vmatpush1.bf16.msra.mxu1 %v3301_v46  ;;  %v3388_v46 = vld [vmem:[#allocation4 + $0x190] ss:$8 sps:$4 sm:$0xff]  }
 0x13d   : > { %1812 = vmatprep.subr.bf16.mxu1 %v3306_v47  ;;  %v3393_v47 = vld [vmem:[#allocation4 + $0x1a4] ss:$8 sps:$4 sm:$0xff]  }
 0x140   : > { %1813 = vmatpush1.bf16.msra.mxu1 %v3304_v48  ;;  %v3391_v48 = vld [vmem:[#allocation4 + $0x1a0] ss:$8 sps:$4 sm:$0xff]  }
 0x141   : > { %1814 = vmatprep.subr.bf16.mxu1 %v3312_v49  ;;  %v3396_v49 = vld [vmem:[#allocation4 + $0x1b4] ss:$8 sps:$4 sm:$0xff]  }
 0x144   : > { %1815 = vmatpush1.bf16.msra.mxu1 %v3310_v50  ;;  %v3394_v50 = vld [vmem:[#allocation4 + $0x1b0] ss:$8 sps:$4 sm:$0xff]  }
 0x145   : > { %2925 = vmatprep.subr.bf16.mxu1 %v3409_v1 }
 0x147   : > { %1817 = vmatmul.mubr.bf16.vlgmr.msra.gmra.mrb[4].mxu1 %v3661_v13  ;;  %v513_v13 = vrot.slane %v3676_v59, %v512_v58 }
 0x148   : > { %2926 = vmatpush3.bf16.msra.mxu1 %v3410_v2 }
 0x149   : > { %2927 = vmatprep.subr.bf16.mxu1 %v3411_v3 }
 0x14c   : > { %2928 = vmatpush3.bf16.msra.mxu1 %v3412_v12 }
 0x14d   : > { %2929 = vmatprep.subr.bf16.mxu1 %v3413_v15 }
 0x150   : > { %2930 = vmatpush3.bf16.msra.mxu1 %v3414_v20  ;;  %v3422_v20 = vld [vmem:[%s3765_s5 + $0x30] sm:$0xff]  }
 0x151   : > { %2931 = vmatprep.subr.bf16.mxu1 %v3415_v23 }
 0x154   : > { %2932 = vmatpush3.bf16.msra.mxu1 %v3416_v6 }
 0x155   : > { %2933 = vmatprep.subr.bf16.mxu1 %v3417_v28 }
 0x158   : > { %2934 = vmatpush3.bf16.msra.mxu1 %v3418_v29 }
 0x159   : > { %2935 = vmatprep.subr.bf16.mxu1 %v3419_v31 }
 0x15a   : > { %v1572_v51 = vpop.f32.mrb[0].mxu1 }
 0x15b   : > { %v1574_v53 = vpop.f32.mrb[1].mxu1  ;;  %v1573_v62 = vadd.f32 %v1572_v51, %v513_v13  ;;  %v3399_v51 = vld [vmem:[#allocation4 + $0x1c4] ss:$8 sps:$4 sm:$0xff]   ;;  %v3403_v13 = vld [vmem:[#allocation4 + $0x1e0] ss:$8 sps:$4 sm:$0xff]  }
 0x15c   : > { %v1576_v54 = vpop.f32.mrb[2].mxu1  ;;  %v1575_v63 = vadd.f32 %v1574_v53, %v517_v61  ;;  %2936 = vmatpush3.bf16.msra.mxu1 %v3420_v33  ;;  %v3397_v53 = vld [vmem:[#allocation4 + $0x1c0] ss:$8 sps:$4 sm:$0xff]   ;;  %v3408_v61 = vld [vmem:[#allocation4 + $0x1f4] ss:$8 sps:$4 sm:$0xff]  }
 0x15d   : > { %v1577_v55 = vpop.f32.mrb[3].mxu1  ;;  %v3402_v54 = vld [vmem:[#allocation4 + $0x1d4] ss:$8 sps:$4 sm:$0xff]  }
 0x15e   : > { %v3400_v55 = vld [vmem:[#allocation4 + $0x1d0] ss:$8 sps:$4 sm:$0xff]  }
 0x1a7   : > { %v1695_v0 = vpop.f32.mrb[0].mxu0 }
 0x1a8   : > { %v2948_v4 = vadd.f32 %v1695_v0, %v1573_v62  ;;  %v1697_v5 = vpop.f32.mrb[1].mxu0  ;;  %v3406_v62 = vld [vmem:[#allocation4 + $0x1f0] ss:$8 sps:$4 sm:$0xff]   ;;  %v524_v0 = vsub.s32 3, %v3670_v57 }
 0x1a9   : > { %v2950_v8 = vadd.f32 %v1697_v5, %v1575_v63  ;;  %v1699_v9 = vpop.f32.mrb[2].mxu0  ;;  %v520_v63 = vsub.s32 2, %v3670_v57  ;;  %v2905_v57 = vld [vmem:[%s3766_s6] ss:$0 sm:$0xff] }
 0x1aa   : > { %vm1866_vm1 = vcmp.gt.f32.partialorder %v2948_v4, 0.0  ;;  %v1870_v10 = vmul.f32 0.2, %v2948_v4  ;;  %v1700_v11 = vpop.f32.mrb[3].mxu0  ;;  %v525_v2 = vrot.slane %v3676_v59, %v524_v0 }
 0x1ab   : > { %vm1867_vm2 = vcmp.gt.f32.partialorder %v2950_v8, 0.0  ;;  %v1871_v14 = vmul.f32 0.2, %v2950_v8  ;;  %v521_v1 = vrot.slane %v3676_v59, %v520_v63  ;;  %v3421_v59 = vld [vmem:[%s3765_s5 + $0x70] sm:$0xff]  }
 0x1ac   : > { %v1874_v16 = vsel %vm1866_vm1, %v2948_v4, %v1870_v10  ;;  %2937 = vmatprep.subr.bf16.mxu1 %v3421_v59 }
 0x1ad   : > { %v1875_v17 = vsel %vm1867_vm2, %v2950_v8, %v1871_v14  ;;  %v1878_v21 = vpack.c.bf16 %v1874_v16, %v1874_v16  ;;  %2938 = vmatpush3.bf16.msra.mxu1 %v3422_v20 }
 0x1ae   : > { %v1879_v18 = vpack.c.bf16 %v1875_v17, %v1875_v17 }
 0x1af   : > { %v3703_v7 = vpop.f32.mrb[4].mxu0 }
 0x1b0   : > { %2310 = vmatprep.mubr.bf16.mxu0 %v1879_v18  ;;  %v3708_v34 = vpop.f32.mrb[5].mxu0 }
 0x1b1   : > { %2311 = vmatmul.mubr.bf16.vlgmr.msra.gmra.mrb[8].mxu0 %v1878_v21  ;;  %v1863_v24 = vpop.f32.mrb[6].mxu0  ;;  %v3423_v21 = vld [vmem:[%s3765_s5 + $0x78] sm:$0xff]  }
 0x1b2   : > { %2320 = vmatpush1.bf16.msra.mxu0 %v3361_v19  ;;  %v1864_v26 = vpop.f32.mrb[7].mxu0  ;;  %2939 = vmatprep.subr.bf16.mxu1 %v3423_v21 }
 0x1b3   : > { %2321 = vmatprep.subr.bf16.mxu0 %v3366_v22  ;;  %v3424_v22 = vld [vmem:[%s3765_s5 + $0x38] sm:$0xff]  }
 0x1b4   : > { %2940 = vmatpush3.bf16.msra.mxu1 %v3424_v22 }
 0x1b6   : > { %2322 = vmatpush1.bf16.msra.mxu0 %v3364_v25 }
 0x1b7   : > { %2323 = vmatprep.subr.bf16.mxu0 %v3369_v27 }
 0x1ba   : > { %2324 = vmatpush1.bf16.msra.mxu0 %v3367_v52 }
 0x1bb   : > { %2325 = vmatprep.subr.bf16.mxu0 %v3372_v30 }
 0x1be   : > { %2326 = vmatpush1.bf16.msra.mxu0 %v3370_v32 }
 0x1bf   : > { %2327 = vmatprep.subr.bf16.mxu0 %v3375_v35 }
 0x1c2   : > { %2328 = vmatpush1.bf16.msra.mxu0 %v3373_v36 }
 0x1c3   : > { %2329 = vmatprep.subr.bf16.mxu0 %v3378_v37 }
 0x1c6   : > { %2330 = vmatpush1.bf16.msra.mxu0 %v3376_v38 }
 0x1c7   : > { %2331 = vmatprep.subr.bf16.mxu0 %v3381_v39 }
 0x1ca   : > { %2332 = vmatpush1.bf16.msra.mxu0 %v3379_v40 }
 0x1cb   : > { %2333 = vmatprep.subr.bf16.mxu0 %v3384_v41 }
 0x1ce   : > { %2334 = vmatpush1.bf16.msra.mxu0 %v3382_v42 }
 0x1cf   : > { %2335 = vmatprep.subr.bf16.mxu0 %v3387_v43 }
 0x1d2   : > { %2336 = vmatpush1.bf16.msra.mxu0 %v3385_v44 }
 0x1d3   : > { %2337 = vmatprep.subr.bf16.mxu0 %v3390_v45 }
 0x1d6   : > { %2338 = vmatpush1.bf16.msra.mxu0 %v3388_v46 }
 0x1d7   : > { %2339 = vmatprep.subr.bf16.mxu0 %v3393_v47 }
 0x1da   : > { %2340 = vmatpush1.bf16.msra.mxu0 %v3391_v48 }
 0x1db   : > { %2341 = vmatprep.subr.bf16.mxu0 %v3396_v49 }
 0x1de   : > { %2342 = vmatpush1.bf16.msra.mxu0 %v3394_v50 }
 0x1df   : > { %2343 = vmatprep.subr.bf16.mxu0 %v3399_v51 }
 0x1e2   : > { %2344 = vmatpush1.bf16.msra.mxu0 %v3397_v53 }
 0x1e3   : > { %2345 = vmatprep.subr.bf16.mxu0 %v3402_v54 }
 0x1e6   : > { %2346 = vmatpush1.bf16.msra.mxu0 %v3400_v55 }
 0x1e7   : > { %2347 = vmatprep.subr.bf16.mxu0 %v3405_v56 }
 0x1ea   : > { %2348 = vmatpush1.bf16.msra.mxu0 %v3403_v13 }
 0x1eb   : > { %2349 = vmatprep.subr.bf16.mxu0 %v3408_v61 }
 0x1ee   : > { %2350 = vmatpush1.bf16.msra.mxu0 %v3406_v62 }
 0x21a   : > { %v1818_v3 = vpop.f32.mrb[4].mxu1 }
 0x21b   : > { %v2951_v4 = vadd.f32 %v1818_v3, %v521_v1  ;;  %v1820_v5 = vpop.f32.mrb[5].mxu1 }
 0x21c   : > { %v2953_v8 = vadd.f32 %v1820_v5, %v525_v2  ;;  %v1822_v9 = vpop.f32.mrb[6].mxu1 }
 0x21d   : > { %v2952_v10 = vadd.f32 %v2951_v4, %v3703_v7  ;;  %v1823_v11 = vpop.f32.mrb[7].mxu1  ;;  %v1946_v7 = vld [vmem:[%s3764_s4] sm:$0x3] }
 0x21e   : > { %v2954_v12 = vadd.f32 %v2953_v8, %v3708_v34  ;;  %v1951_v23 = vrot.slane %v1946_v7, %v512_v58  ;;  %v1955_v34 = vrot.slane %v1946_v7, %v516_v60 }
 0x21f   : > { %vm1868_vm3 = vcmp.gt.f32.partialorder %v2952_v10, 0.0  ;;  %v1872_v14 = vmul.f32 0.2, %v2952_v10 }
 0x220   : > { %v1873_v15 = vmul.f32 0.2, %v2954_v12  ;;  %vm1869_vm4 = vcmp.gt.f32.partialorder %v2954_v12, 0.0 }
 0x221   : > { %v1876_v16 = vsel %vm1868_vm3, %v2952_v10, %v1872_v14 }
 0x222   : > { %v1877_v17 = vsel %vm1869_vm4, %v2954_v12, %v1873_v15  ;;  %v1880_v19 = vpack.c.bf16 %v1876_v16, %v1876_v16 }
 0x223   : > { %v1881_v18 = vpack.c.bf16 %v1877_v17, %v1877_v17 }
 0x225   : > { %2351 = vmatprep.mubr.bf16.mxu0 %v1881_v18 }
 0x226   : > { %2352 = vmatmul.mubr.bf16.vlgmr.msra.gmra.mrb[8].mxu0 %v1880_v19 }
 0x2f9   : > { %v2353_v24 = vpop.f32.mrb[8].mxu0 }
 0x2fa   : > { %v2955_v25 = vadd.f32 %v2353_v24, %v1951_v23  ;;  %v2355_v26 = vpop.f32.mrb[9].mxu0 }
 0x2fb   : > { %v2956_v6 = vadd.f32 %v2355_v26, %v1955_v34  ;;  %v2357_v27 = vpop.f32.mrb[10].mxu0 }
 0x2fc   : > { %vm2360_vm5 = vcmp.gt.f32.partialorder %v2955_v25, 0.0  ;;  %v2362_v28 = vmul.f32 0.2, %v2955_v25  ;;  %v2358_v52 = vpop.f32.mrb[11].mxu0 }
 0x2fd   : > { %vm2361_vm6 = vcmp.gt.f32.partialorder %v2956_v6, 0.0  ;;  %v2363_v29 = vmul.f32 0.2, %v2956_v6 }
 0x2fe   : > { %v2364_v30 = vsel %vm2360_vm5, %v2955_v25, %v2362_v28 }
 0x2ff   : > { %v2365_v31 = vsel %vm2361_vm6, %v2956_v6, %v2363_v29  ;;  %v2366_v33 = vpack.c.bf16 %v2364_v30, %v2364_v30 }
 0x300   : > { %v2367_v32 = vpack.c.bf16 %v2365_v31, %v2365_v31 }
 0x302   : > { %2535 = vmatprep.mubr.bf16.mxu1 %v2367_v32 }
 0x303   : > { %2536 = vmatmul.mubr.bf16.vlgmr.msra.gmra.mrb[8].mxu1 %v2366_v33 }
 0x3d6   : > { %v2941_v58 = vpop.f32.mrb[8].mxu1 }
 0x3d7   : > { %v2942_v60 = vpop.f32.mrb[9].mxu1 }
 0x3d8   : > { %v2943_v35 = vadd.f32 %v2942_v60, %v2941_v58  ;;  %v2944_v36 = vpop.f32.mrb[10].mxu1 }
 0x3d9   : > { %v2945_v37 = vpop.f32.mrb[11].mxu1 }
 0x3da   : > { %v2538_v38 = vadd.f32 %v2943_v35, %v2905_v57 }
 0x3dc   : > { %v2922_v39 = vmul.f32 -1.442695, %v2538_v38 }
 0x3de   : > { %3425 = vpow2.f32 %v2922_v39 }
 0x3e8   : > { %v3426_v40 = vpop.eup %3425 }
 0x3e9   : > { %v2546_v41 = vadd.f32 1.0, %v3426_v40 }
 0x3eb   : > { %3427 = vrcp.f32 %v2546_v41 }
 0x3f5   : > { %v3428_v42 = vpop.eup %3427 }
 0x3f6   : > { %2549 = vst [vmem:[%s306_s15] sm:$0xff] %v3428_v42 }
 0x3f7 PF: > { %s19_s24 = sadd.s32 1, %s3499_s24  }
 0x3f8   : > { %p16_p9 = scmp.ge.s32.totalorder %s19_s24, 4  }
 0x3fa   :  { %18 = sbr.rel (!%p16_p9) target bundleno = 2 (0x2), region = 87 }
 0x401   :  { %2569 = vsyncpa [#allocation3], 1 }
 0x402   :  { %2571 = vsyncpa [#allocation3 + $0x1], 1 }
 0x403   :  { %2572 = vsyncpa [#allocation5], 1 }

</bundles_post_ra>
